<compile_context>
chip_gen: v7x
topology: tpu7x:2x2x1
jax: 0.10.0
libtpu: 0.0.40
codegen_flags: <defaults>
</compile_context>

<pallas_src>
import functools

import jax
import jax.numpy as jnp
from jax.experimental import pallas as pl
from jax.experimental.pallas import tpu as pltpu


# ---------------------------------------------------------------------------
# helpers
# ---------------------------------------------------------------------------
def _round_up(n: int, m: int) -> int:
    return ((n + m - 1) // m) * m


def _weight_norm(v: jax.Array, g: jax.Array) -> jax.Array:
    """PyTorch weight_norm (dim=0): w = g * v / ||v||, norm over all dims but 0."""
    norm = jnp.sqrt(jnp.sum(v * v, axis=tuple(range(1, v.ndim)), keepdims=True))
    return (g.reshape((-1,) + (1,) * (v.ndim - 1)) / norm) * v


def _pick_batch_tile(n: int) -> int:
    """Largest divisor of n that is <= 8 and still leaves >= 2 grid steps."""
    if n <= 1:
        return 1
    limit = min(8, n // 2)
    best = 1
    for cand in range(1, limit + 1):
        if n % cand == 0:
            best = cand
    return best


# ---------------------------------------------------------------------------
# fused whole-TCN kernel
# ---------------------------------------------------------------------------
def _tcn_kernel(x_ref, t_ref, *rest, block_meta):
    """Whole TemporalConvNet for one batch-lane tile.

    x_ref : (Cin_p, lanes)  activations, batch flattened into lanes
    t_ref : (1, lanes)      time index within each Lp segment (int32)
    rest  : 4 weight refs per block (W1, b1, W2, b2), then the output ref
    """
    o_ref = rest[-1]
    w_refs = rest[:-1]

    t_idx = t_ref[...]                              # (1, lanes), built once, reused
    h = x_ref[...].astype(jnp.float32)              # (cin_p, lanes)

    wi = 0
    for (dil, has_ds, cin_p, cout_p) in block_meta:
        w1 = w_refs[wi][...]
        b1 = w_refs[wi + 1][...]
        w2 = w_refs[wi + 2][...]
        b2 = w_refs[wi + 3][...]
        wi += 4

        keep = t_idx >= dil                         # causal mask, shared by both convs

        # conv1 (+ 1x1 downsample rows) : single MXU matmul, chomp fused
        hs = jnp.where(keep, pltpu.roll(h, shift=dil, axis=1), 0.0)
        z = jnp.dot(w1, jnp.concatenate([hs, h], axis=0),
                    preferred_element_type=jnp.float32) + b1
        if has_ds:
            h1 = jnp.maximum(z[:cout_p], 0.0)       # relu1 (dropout1 = identity)
            res = z[cout_p:]                        # downsample output (+ bias)
        else:
            h1 = jnp.maximum(z, 0.0)
            res = h                                 # identity residual

        # conv2 : single MXU matmul, chomp fused
        h1s = jnp.where(keep, pltpu.roll(h1, shift=dil, axis=1), 0.0)
        h2 = jnp.dot(w2, jnp.concatenate([h1s, h1], axis=0),
                     preferred_element_type=jnp.float32) + b2
        h2 = jnp.maximum(h2, 0.0)                   # relu2 (dropout2 = identity)

        h = jnp.maximum(h2 + res, 0.0)              # residual + final ReLU

    o_ref[...] = h.astype(o_ref.dtype)


# ---------------------------------------------------------------------------
# parameter preparation (done ONCE): merge taps, pad to tile shapes
# ---------------------------------------------------------------------------
def _prepare_params(params):
    weights = []
    meta = []
    for i, blk in enumerate(params):
        dil = 2 ** i
        cout, cin, k = blk["w1"].shape
        assert k == 2, "fused kernel assumes kernel_size == 2"
        cin_p = _round_up(cin, 8)
        cout_p = _round_up(cout, 8)
        has_ds = blk["wd"] is not None
        if not has_ds:
            assert cin_p == cout_p, "identity residual requires matching channels"

        w1a = blk["w1"][:, :, 0]                    # tap on x[t-d]
        w1b = blk["w1"][:, :, 1]                    # tap on x[t]

        rows1 = 2 * cout_p if has_ds else cout_p
        W1 = jnp.zeros((rows1, 2 * cin_p), jnp.float32)
        W1 = W1.at[:cout, :cin].set(w1a)
        W1 = W1.at[:cout, cin_p:cin_p + cin].set(w1b)
        b1 = jnp.zeros((rows1, 1), jnp.float32)
        b1 = b1.at[:cout, 0].set(blk["b1"])
        if has_ds:
            W1 = W1.at[cout_p:cout_p + cout, cin_p:cin_p + cin].set(blk["wd"])
            b1 = b1.at[cout_p:cout_p + cout, 0].set(blk["bd"])

        W2 = jnp.zeros((cout_p, 2 * cout_p), jnp.float32)
        W2 = W2.at[:cout, :cout].set(blk["w2"][:, :, 0])
        W2 = W2.at[:cout, cout_p:cout_p + cout].set(blk["w2"][:, :, 1])
        b2 = jnp.zeros((cout_p, 1), jnp.float32).at[:cout, 0].set(blk["b2"])

        weights += [W1, b1, W2, b2]
        meta.append((dil, has_ds, cin_p, cout_p))

    return {
        "weights": weights,
        "meta": tuple(meta),
        "c_in": params[0]["w1"].shape[1],
        "cin_p": _round_up(params[0]["w1"].shape[1], 8),
        "c_last": params[-1]["w1"].shape[0],
        "cout_last_p": _round_up(params[-1]["w1"].shape[0], 8),
    }


# ---------------------------------------------------------------------------
# TCN_FeatureExtractor forward: x (N, L, C_in) -> (N, L, num_channels[-1])
# ---------------------------------------------------------------------------
def make_tcn_forward(params):
    prep = _prepare_params(params)
    meta = prep["meta"]
    weights = prep["weights"]
    c_in, cin_p = prep["c_in"], prep["cin_p"]
    c_last, cout_last_p = prep["c_last"], prep["cout_last_p"]

    @jax.jit
    def forward(x):
        n, l, cf = x.shape
        assert cf == c_in, (cf, c_in)
        lp = _round_up(max(l, 128), 128)            # lane-dense time axis
        b_tile = _pick_batch_tile(n)
        lanes = b_tile * lp

        # (N, L, C) -> (C_p, N*Lp): batch flattened into lanes, channels padded.
        h = jnp.transpose(x, (2, 0, 1))             # (C, N, L)
        h = jnp.pad(h, ((0, cin_p - cf), (0, 0), (0, lp - l)))
        h = h.reshape(cin_p, n * lp)

        # Per-lane time index within each Lp segment (for the causal mask).
        t_idx = jnp.tile(jnp.arange(lp, dtype=jnp.int32), n).reshape(1, n * lp)

        in_specs = [
            pl.BlockSpec((cin_p, lanes), lambda i: (0, i)),
            pl.BlockSpec((1, lanes), lambda i: (0, i)),
        ]
        for w in weights:
            in_specs.append(pl.BlockSpec(w.shape, lambda i: (0, 0)))

        # Rough VMEM budget (activations + double-buffered I/O + weights).
        max_cp = max(max(ci, co) for (_, _, ci, co) in meta)
        est = 4 * lanes * (2 * (cin_p + cout_last_p + 1) + 12 * max_cp)
        est += 8 * sum(int(w.size) for w in weights)
        vmem_limit = int(min(64 * 1024 * 1024, max(16 * 1024 * 1024, 4 * est)))

        out2d = pl.pallas_call(
            functools.partial(_tcn_kernel, block_meta=meta),
            out_shape=jax.ShapeDtypeStruct((cout_last_p, n * lp), x.dtype),
            grid=(n // b_tile,),
            in_specs=in_specs,
            out_specs=pl.BlockSpec((cout_last_p, lanes), lambda i: (0, i)),
            compiler_params=pltpu.CompilerParams(
                dimension_semantics=("parallel",),
                vmem_limit_bytes=vmem_limit),
        )(h, t_idx, *weights)

        out = out2d.reshape(cout_last_p, n, lp)[:c_last, :, :l]
        return jnp.transpose(out, (1, 2, 0))        # (N, L, C_last)

    return forward


def tcn_feature_extractor_forward(x: jax.Array, params) -> jax.Array:
    """Convenience one-shot wrapper (prefer make_tcn_forward for reuse)."""
    return make_tcn_forward(params)(x)


# ---------------------------------------------------------------------------
# parameter init (mirrors init_weights: weights ~ N(0, 0.01); weight_norm g=||v||)
# ---------------------------------------------------------------------------
def init_tcn_params(key, num_inputs: int, num_channels, kernel_size: int = 2):
    params = []
    in_ch = num_inputs
    for i, out_ch in enumerate(num_channels):
        keys = jax.random.split(jax.random.fold_in(key, i), 6)
        v1 = 0.01 * jax.random.normal(keys[0], (out_ch, in_ch, kernel_size), jnp.float32)
        g1 = jnp.sqrt(jnp.sum(v1 * v1, axis=(1, 2)))
        v2 = 0.01 * jax.random.normal(keys[1], (out_ch, out_ch, kernel_size), jnp.float32)
        g2 = jnp.sqrt(jnp.sum(v2 * v2, axis=(1, 2)))
        blk = {
            "w1": _weight_norm(v1, g1),
            "b1": 0.05 * jax.random.normal(keys[2], (out_ch,), jnp.float32),
            "w2": _weight_norm(v2, g2),
            "b2": 0.05 * jax.random.normal(keys[3], (out_ch,), jnp.float32),
            "wd": None,
            "bd": None,
        }
        if in_ch != out_ch:
            blk["wd"] = 0.01 * jax.random.normal(keys[4], (out_ch, in_ch), jnp.float32)
            blk["bd"] = 0.05 * jax.random.normal(keys[5], (out_ch,), jnp.float32)
        params.append(blk)
        in_ch = out_ch
    return params


# ---------------------------------------------------------------------------
# pure-JAX reference (independent: lax.conv_general_dilated like nn.Conv1d)
# ---------------------------------------------------------------------------
def _ref_causal_conv(x, w, b, dilation):
    k = w.shape[-1]
    pad = (k - 1) * dilation
    y = jax.lax.conv_general_dilated(
        x, w, window_strides=(1,), padding=[(pad, pad)],
        rhs_dilation=(dilation,), dimension_numbers=("NCH", "OIH", "NCH"))
    y = y[:, :, : x.shape[-1]]                      # Chomp1d(pad)
    return y + b[None, :, None]


def tcn_reference(x, params):
    h = jnp.transpose(x, (0, 2, 1))
    for i, blk in enumerate(params):
        d = 2 ** i
        out = jax.nn.relu(_ref_causal_conv(h, blk["w1"], blk["b1"], d))
        out = jax.nn.relu(_ref_causal_conv(out, blk["w2"], blk["b2"], d))
        if blk["wd"] is not None:
            res = jnp.einsum("oi,nil->nol", blk["wd"], h) + blk["bd"][None, :, None]
        else:
            res = h
        h = jax.nn.relu(out + res)
    return jnp.transpose(h, (0, 2, 1))


# ---------------------------------------------------------------------------
if __name__ == "__main__":
    key = jax.random.PRNGKey(0)
    N, L, F = 2, 16, 5                # (batch, seq, features) as fed to the module
    feature_layer = [8, 8]            # num_channels of the TemporalConvNet

    kx, kp = jax.random.split(key)
    x = jax.random.normal(kx, (N, L, F), dtype=jnp.float32)
    params = init_tcn_params(kp, num_inputs=F, num_channels=feature_layer)

    forward = make_tcn_forward(params)
    out = jax.block_until_ready(forward(x))

    assert out.shape == (N, L, feature_layer[-1]), out.shape
    assert out.dtype == jnp.float32

    ref = tcn_reference(x, params)
    max_err = float(jnp.max(jnp.abs(out - ref)))
    assert jnp.allclose(out, ref, atol=2e-3, rtol=2e-2), f"max abs err {max_err}"

    print("KERNEL_OK")
</pallas_src>

<mosaic_0001>
module attributes {stable_mosaic.version = 11 : i64} {
  func.func @_tcn_kernel(%arg0: i32, %arg1: memref<8x128xf32, #tpu.memory_space<vmem>>, %arg2: memref<1x128xi32, #tpu.memory_space<vmem>>, %arg3: memref<16x16xf32, #tpu.memory_space<vmem>>, %arg4: memref<16x1xf32, #tpu.memory_space<vmem>>, %arg5: memref<8x16xf32, #tpu.memory_space<vmem>>, %arg6: memref<8x1xf32, #tpu.memory_space<vmem>>, %arg7: memref<8x16xf32, #tpu.memory_space<vmem>>, %arg8: memref<8x1xf32, #tpu.memory_space<vmem>>, %arg9: memref<8x16xf32, #tpu.memory_space<vmem>>, %arg10: memref<8x1xf32, #tpu.memory_space<vmem>>, %arg11: memref<8x128xf32, #tpu.memory_space<vmem>>) attributes {dimension_semantics = [#tpu.dimension_semantics<parallel>], iteration_bounds = array<i64: 2>, scalar_prefetch = 0 : i64, scratch_operands = 0 : i64, tpu.core_type = #tpu.core_type<tc>, window_params = [{transform_indices = @transform_0, window_bounds = array<i64: 8, 128>}, {transform_indices = @transform_1, window_bounds = array<i64: 1, 128>}, {pipeline_mode = #tpu.pipeline_mode<synchronous>, transform_indices = @transform_2, window_bounds = array<i64: 16, 16>}, {pipeline_mode = #tpu.pipeline_mode<synchronous>, transform_indices = @transform_3, window_bounds = array<i64: 16, 1>}, {pipeline_mode = #tpu.pipeline_mode<synchronous>, transform_indices = @transform_4, window_bounds = array<i64: 8, 16>}, {pipeline_mode = #tpu.pipeline_mode<synchronous>, transform_indices = @transform_5, window_bounds = array<i64: 8, 1>}, {pipeline_mode = #tpu.pipeline_mode<synchronous>, transform_indices = @transform_6, window_bounds = array<i64: 8, 16>}, {pipeline_mode = #tpu.pipeline_mode<synchronous>, transform_indices = @transform_7, window_bounds = array<i64: 8, 1>}, {pipeline_mode = #tpu.pipeline_mode<synchronous>, transform_indices = @transform_8, window_bounds = array<i64: 8, 16>}, {pipeline_mode = #tpu.pipeline_mode<synchronous>, transform_indices = @transform_9, window_bounds = array<i64: 8, 1>}, {transform_indices = @transform_10, window_bounds = array<i64: 8, 128>}]} {
    %c0 = arith.constant 0 : index
    %c0_0 = arith.constant 0 : index
    %0 = vector.load %arg2[%c0, %c0_0] : memref<1x128xi32, #tpu.memory_space<vmem>>, vector<1x128xi32>
    %c0_1 = arith.constant 0 : index
    %c0_2 = arith.constant 0 : index
    %1 = vector.load %arg1[%c0_1, %c0_2] : memref<8x128xf32, #tpu.memory_space<vmem>>, vector<8x128xf32>
    %c0_3 = arith.constant 0 : index
    %c0_4 = arith.constant 0 : index
    %2 = vector.load %arg3[%c0_3, %c0_4] : memref<16x16xf32, #tpu.memory_space<vmem>>, vector<16x16xf32>
    %c0_5 = arith.constant 0 : index
    %c0_6 = arith.constant 0 : index
    %3 = vector.load %arg4[%c0_5, %c0_6] : memref<16x1xf32, #tpu.memory_space<vmem>>, vector<16x1xf32>
    %c0_7 = arith.constant 0 : index
    %c0_8 = arith.constant 0 : index
    %4 = vector.load %arg5[%c0_7, %c0_8] : memref<8x16xf32, #tpu.memory_space<vmem>>, vector<8x16xf32>
    %c0_9 = arith.constant 0 : index
    %c0_10 = arith.constant 0 : index
    %5 = vector.load %arg6[%c0_9, %c0_10] : memref<8x1xf32, #tpu.memory_space<vmem>>, vector<8x1xf32>
    %c1_i32 = arith.constant 1 : i32
    %6 = vector.broadcast %c1_i32 : i32 to vector<1x128xi32>
    %7 = arith.cmpi sge, %0, %6 : vector<1x128xi32>
    %c1_i32_11 = arith.constant 1 : i32
    %8 = tpu.dynamic_rotate %1 by %c1_i32_11 dim 1 : vector<8x128xf32>, i32 -> vector<8x128xf32>
    %cst = arith.constant 0.000000e+00 : f32
    %9 = vector.shape_cast %7 : vector<1x128xi1> to vector<1x128xi1>
    %10 = vector.broadcast %9 : vector<1x128xi1> to vector<8x128xi1>
    %11 = vector.broadcast %cst : f32 to vector<8x128xf32>
    %12 = arith.select %10, %8, %11 : vector<8x128xi1>, vector<8x128xf32>
    %13 = tpu.concatenate %12, %1 in 0 : vector<8x128xf32>, vector<8x128xf32> -> vector<16x128xf32>
    %cst_12 = arith.constant dense<0.000000e+00> : vector<16x128xf32>
    %14 = tpu.matmul %2, %13, %cst_12 {dimension_numbers = #tpu.dot_dimension_numbers<[1], [0], [0], [1], [0, 0, 1, 1], [], []>} : vector<16x16xf32>, vector<16x128xf32>, vector<16x128xf32> -> vector<16x128xf32>
    %15 = vector.broadcast %3 : vector<16x1xf32> to vector<16x128xf32>
    %16 = arith.addf %14, %15 : vector<16x128xf32>
    %17 = vector.extract_strided_slice %16 {offsets = [0, 0], sizes = [8, 128], strides = [1, 1]} : vector<16x128xf32> to vector<8x128xf32>
    %cst_13 = arith.constant 0.000000e+00 : f32
    %18 = vector.broadcast %cst_13 : f32 to vector<8x128xf32>
    %19 = arith.maximumf %17, %18 : vector<8x128xf32>
    %20 = vector.extract_strided_slice %16 {offsets = [8, 0], sizes = [8, 128], strides = [1, 1]} : vector<16x128xf32> to vector<8x128xf32>
    %c1_i32_14 = arith.constant 1 : i32
    %21 = tpu.dynamic_rotate %19 by %c1_i32_14 dim 1 : vector<8x128xf32>, i32 -> vector<8x128xf32>
    %cst_15 = arith.constant 0.000000e+00 : f32
    %22 = vector.shape_cast %7 : vector<1x128xi1> to vector<1x128xi1>
    %23 = vector.broadcast %22 : vector<1x128xi1> to vector<8x128xi1>
    %24 = vector.broadcast %cst_15 : f32 to vector<8x128xf32>
    %25 = arith.select %23, %21, %24 : vector<8x128xi1>, vector<8x128xf32>
    %26 = tpu.concatenate %25, %19 in 0 : vector<8x128xf32>, vector<8x128xf32> -> vector<16x128xf32>
    %cst_16 = arith.constant dense<0.000000e+00> : vector<8x128xf32>
    %27 = tpu.matmul %4, %26, %cst_16 {dimension_numbers = #tpu.dot_dimension_numbers<[1], [0], [0], [1], [0, 0, 1, 1], [], []>} : vector<8x16xf32>, vector<16x128xf32>, vector<8x128xf32> -> vector<8x128xf32>
    %28 = vector.broadcast %5 : vector<8x1xf32> to vector<8x128xf32>
    %29 = arith.addf %27, %28 : vector<8x128xf32>
    %cst_17 = arith.constant 0.000000e+00 : f32
    %30 = vector.broadcast %cst_17 : f32 to vector<8x128xf32>
    %31 = arith.maximumf %29, %30 : vector<8x128xf32>
    %32 = arith.addf %31, %20 : vector<8x128xf32>
    %cst_18 = arith.constant 0.000000e+00 : f32
    %33 = vector.broadcast %cst_18 : f32 to vector<8x128xf32>
    %34 = arith.maximumf %32, %33 : vector<8x128xf32>
    %c0_19 = arith.constant 0 : index
    %c0_20 = arith.constant 0 : index
    %35 = vector.load %arg7[%c0_19, %c0_20] : memref<8x16xf32, #tpu.memory_space<vmem>>, vector<8x16xf32>
    %c0_21 = arith.constant 0 : index
    %c0_22 = arith.constant 0 : index
    %36 = vector.load %arg8[%c0_21, %c0_22] : memref<8x1xf32, #tpu.memory_space<vmem>>, vector<8x1xf32>
    %c0_23 = arith.constant 0 : index
    %c0_24 = arith.constant 0 : index
    %37 = vector.load %arg9[%c0_23, %c0_24] : memref<8x16xf32, #tpu.memory_space<vmem>>, vector<8x16xf32>
    %c0_25 = arith.constant 0 : index
    %c0_26 = arith.constant 0 : index
    %38 = vector.load %arg10[%c0_25, %c0_26] : memref<8x1xf32, #tpu.memory_space<vmem>>, vector<8x1xf32>
    %c2_i32 = arith.constant 2 : i32
    %39 = vector.broadcast %c2_i32 : i32 to vector<1x128xi32>
    %40 = arith.cmpi sge, %0, %39 : vector<1x128xi32>
    %c2_i32_27 = arith.constant 2 : i32
    %41 = tpu.dynamic_rotate %34 by %c2_i32_27 dim 1 : vector<8x128xf32>, i32 -> vector<8x128xf32>
    %cst_28 = arith.constant 0.000000e+00 : f32
    %42 = vector.shape_cast %40 : vector<1x128xi1> to vector<1x128xi1>
    %43 = vector.broadcast %42 : vector<1x128xi1> to vector<8x128xi1>
    %44 = vector.broadcast %cst_28 : f32 to vector<8x128xf32>
    %45 = arith.select %43, %41, %44 : vector<8x128xi1>, vector<8x128xf32>
    %46 = tpu.concatenate %45, %34 in 0 : vector<8x128xf32>, vector<8x128xf32> -> vector<16x128xf32>
    %cst_29 = arith.constant dense<0.000000e+00> : vector<8x128xf32>
    %47 = tpu.matmul %35, %46, %cst_29 {dimension_numbers = #tpu.dot_dimension_numbers<[1], [0], [0], [1], [0, 0, 1, 1], [], []>} : vector<8x16xf32>, vector<16x128xf32>, vector<8x128xf32> -> vector<8x128xf32>
    %48 = vector.broadcast %36 : vector<8x1xf32> to vector<8x128xf32>
    %49 = arith.addf %47, %48 : vector<8x128xf32>
    %cst_30 = arith.constant 0.000000e+00 : f32
    %50 = vector.broadcast %cst_30 : f32 to vector<8x128xf32>
    %51 = arith.maximumf %49, %50 : vector<8x128xf32>
    %c2_i32_31 = arith.constant 2 : i32
    %52 = tpu.dynamic_rotate %51 by %c2_i32_31 dim 1 : vector<8x128xf32>, i32 -> vector<8x128xf32>
    %cst_32 = arith.constant 0.000000e+00 : f32
    %53 = vector.shape_cast %40 : vector<1x128xi1> to vector<1x128xi1>
    %54 = vector.broadcast %53 : vector<1x128xi1> to vector<8x128xi1>
    %55 = vector.broadcast %cst_32 : f32 to vector<8x128xf32>
    %56 = arith.select %54, %52, %55 : vector<8x128xi1>, vector<8x128xf32>
    %57 = tpu.concatenate %56, %51 in 0 : vector<8x128xf32>, vector<8x128xf32> -> vector<16x128xf32>
    %cst_33 = arith.constant dense<0.000000e+00> : vector<8x128xf32>
    %58 = tpu.matmul %37, %57, %cst_33 {dimension_numbers = #tpu.dot_dimension_numbers<[1], [0], [0], [1], [0, 0, 1, 1], [], []>} : vector<8x16xf32>, vector<16x128xf32>, vector<8x128xf32> -> vector<8x128xf32>
    %59 = vector.broadcast %38 : vector<8x1xf32> to vector<8x128xf32>
    %60 = arith.addf %58, %59 : vector<8x128xf32>
    %cst_34 = arith.constant 0.000000e+00 : f32
    %61 = vector.broadcast %cst_34 : f32 to vector<8x128xf32>
    %62 = arith.maximumf %60, %61 : vector<8x128xf32>
    %63 = arith.addf %62, %34 : vector<8x128xf32>
    %cst_35 = arith.constant 0.000000e+00 : f32
    %64 = vector.broadcast %cst_35 : f32 to vector<8x128xf32>
    %65 = arith.maximumf %63, %64 : vector<8x128xf32>
    %c0_36 = arith.constant 0 : index
    %c0_37 = arith.constant 0 : index
    %66 = vector.load %arg11[%c0_36, %c0_37] : memref<8x128xf32, #tpu.memory_space<vmem>>, vector<8x128xf32>
    tpu.vector_store %arg11[%c0_36, %c0_37], %65 {strides = array<i32>} : memref<8x128xf32, #tpu.memory_space<vmem>>, vector<8x128xf32>,
    return
  }
  func.func @transform_0(%arg0: i32) -> (i32, i32) {
    %c0_i32 = arith.constant 0 : i32
    %c0_i32_0 = arith.constant 0 : i32
    return %c0_i32, %arg0 : i32, i32
  }
  func.func @transform_1(%arg0: i32) -> (i32, i32) {
    %c0_i32 = arith.constant 0 : i32
    %c0_i32_0 = arith.constant 0 : i32
    return %c0_i32, %arg0 : i32, i32
  }
  func.func @transform_2(%arg0: i32) -> (i32, i32) {
    %c0_i32 = arith.constant 0 : i32
    %c0_i32_0 = arith.constant 0 : i32
    %c0_i32_1 = arith.constant 0 : i32
    return %c0_i32, %c0_i32_0 : i32, i32
  }
  func.func @transform_3(%arg0: i32) -> (i32, i32) {
    %c0_i32 = arith.constant 0 : i32
    %c0_i32_0 = arith.constant 0 : i32
    %c0_i32_1 = arith.constant 0 : i32
    return %c0_i32, %c0_i32_0 : i32, i32
  }
  func.func @transform_4(%arg0: i32) -> (i32, i32) {
    %c0_i32 = arith.constant 0 : i32
    %c0_i32_0 = arith.constant 0 : i32
    %c0_i32_1 = arith.constant 0 : i32
    return %c0_i32, %c0_i32_0 : i32, i32
  }
  func.func @transform_5(%arg0: i32) -> (i32, i32) {
    %c0_i32 = arith.constant 0 : i32
    %c0_i32_0 = arith.constant 0 : i32
    %c0_i32_1 = arith.constant 0 : i32
    return %c0_i32, %c0_i32_0 : i32, i32
  }
  func.func @transform_6(%arg0: i32) -> (i32, i32) {
    %c0_i32 = arith.constant 0 : i32
    %c0_i32_0 = arith.constant 0 : i32
    %c0_i32_1 = arith.constant 0 : i32
    return %c0_i32, %c0_i32_0 : i32, i32
  }
  func.func @transform_7(%arg0: i32) -> (i32, i32) {
    %c0_i32 = arith.constant 0 : i32
    %c0_i32_0 = arith.constant 0 : i32
    %c0_i32_1 = arith.constant 0 : i32
    return %c0_i32, %c0_i32_0 : i32, i32
  }
  func.func @transform_8(%arg0: i32) -> (i32, i32) {
    %c0_i32 = arith.constant 0 : i32
    %c0_i32_0 = arith.constant 0 : i32
    %c0_i32_1 = arith.constant 0 : i32
    return %c0_i32, %c0_i32_0 : i32, i32
  }
  func.func @transform_9(%arg0: i32) -> (i32, i32) {
    %c0_i32 = arith.constant 0 : i32
    %c0_i32_0 = arith.constant 0 : i32
    %c0_i32_1 = arith.constant 0 : i32
    return %c0_i32, %c0_i32_0 : i32, i32
  }
  func.func @transform_10(%arg0: i32) -> (i32, i32) {
    %c0_i32 = arith.constant 0 : i32
    %c0_i32_0 = arith.constant 0 : i32
    return %c0_i32, %arg0 : i32, i32
  }
}

</mosaic_0001>

<bundles_post_ra>
// kernel: forward.1
= control target key start
LH: loop header
LB: loop body
LE: loop exit
PB: predicated region body
PF: predicated region fallthrough
CT: control target
= control target key end

     0   :  { %15 = vsyncpa [#allocation3], 0  ;;  %s1039_s13 = smov 0   ;;  %s1161_s0 = inlined_call_operand.vmem [shape: f32[8,256], index: 0, kind: input, shape index: {}]   ;;  %s1162_s1 = inlined_call_operand.vmem [shape: s32[1,256], index: 1, kind: input, shape index: {}]   ;;  %s1163_s2 = inlined_call_operand.vmem [shape: f32[16,16], index: 2, kind: input, shape index: {}]   ;;  %s1164_s3 = inlined_call_operand.vmem [shape: f32[16,1], index: 3, kind: input, shape index: {}]   ;;  %s1165_s4 = inlined_call_operand.hbm [shape: f32[8,16], index: 4, kind: input, shape index: {}]   ;;  %s1166_s5 = inlined_call_operand.vmem [shape: f32[8,1], index: 5, kind: input, shape index: {}]   ;;  %s1167_s6 = inlined_call_operand.vmem [shape: f32[8,16], index: 6, kind: input, shape index: {}]   ;;  %s1168_s7 = inlined_call_operand.vmem [shape: f32[8,1], index: 7, kind: input, shape index: {}]   ;;  %s1169_s8 = inlined_call_operand.vmem [shape: f32[8,16], index: 8, kind: input, shape index: {}]   ;;  %s1170_s9 = inlined_call_operand.vmem [shape: f32[8,1], index: 9, kind: input, shape index: {}]   ;;  %s1171_s10 = inlined_call_operand.vmem [shape: f32[8,256], index: 10, kind: output, shape index: {}]  }
   0x1 LB: > { %s1045_s14 = sadd.s32 4294967295, %s974_s13   ;;  %p831_p0 = scmp.ge.s32.totalorder %s974_s13, 1  ;;  %s974_s13 = sphi %s1039_s13, %s21_s13  }
   0x2   : > { %p272_p1 = scmp.lt.s32.totalorder %s974_s13, 3  ;;  %p1172_p3 = scmp.eq.s32.totalorder %s1045_s14, 0 }
   0x3   : > { %s976_s16 = smov [#allocation2]   ;;  %s936_s21 = scalar_lea.hbm %s1165_s4, 128 }
   0x4   : > { %p1049_p2 = pnand %p831_p0, %p272_p1  ;;  %s291_s17 = sshll.u32 %s976_s16, 4  ;;  %s292_s17 = int_to_ptr.vmem [resolvable:$true] %s291_s17 }
   0x5   : > { %p937_p6 = scmp.ne.s32.totalorder %s1165_s4, %s936_s21  ;;  %p943_p10 = scmp.lt.u32.totalorder %s936_s21, %s1165_s4 }
   0x6   : > { %s1174_s15 = scalar_select %p1049_p2, 1, 0 }
   0x7   : > { %p912_p4 = pneg %p1049_p2 }
   0x9   : > { %p1058_p5 = pnand %p1172_p3, %p912_p4 }
   0xb   : > { %p938_p7 = pneg %p1058_p5 }
   0xd   : > { %p939_p8 = pnand %p938_p7, %p937_p6 }
   0xf   : > { %p940_p9 = pneg %p939_p8 }
  0x11   : > { %p945_p11 = pnand %p943_p10, %p940_p9 }
  0x13   : > { %948 = shalt.err (!%p945_p11)
}
  0x14   : > { %s949_s26 = scalar_lea.vmem %s292_s17, 128  ;;  %p957_p1 = scmp.lt.s32.totalorder %s292_s17, %s292_s17 }
  0x15   : > { %p950_p12 = scmp.ne.s32.totalorder %s292_s17, %s949_s26  ;;  %p958_p4 = scmp.lt.s32.totalorder %s949_s26, %s949_s26 }
  0x17   : > { %p952_p13 = pnand %p950_p12, %p938_p7  ;;  %p959_p3 = por %p958_p4, %p957_p1 }
  0x19   : > { %p953_p0 = pneg %p952_p13 }
  0x1b   : > { %p960_p2 = pnand %p959_p3, %p953_p0 }
  0x1d   : > { %963 = shalt.err (!%p960_p2)
}
  0x1e   : > { %915 = dma.hbm_to_vmem [thread:$0]  (!%p1058_p5), %s1165_s4, 128, %s292_s17, [#allocation3]  }
  0x1f   : > { %p1176_p6 = scmp.ne.s32.totalorder %s1174_s15, 0 }
  0x20   : > { %p1177_p8 = scmp.eq.s32.totalorder (!%p1176_p6), %s1045_s14, 0 }
  0x21   : > { %332 = sbr.rel (%p1176_p6) target bundleno = 1402 (0x57a), region = 60 }
  0x28   : > { %969 = dma.done.wait (%p1177_p8), [#allocation3], 128   ;;  %p1178_p7 = pmov %p1177_p8 }
  0x29   : > { %p371_p9 = scmp.lt.s32.totalorder %s1045_s14, 1  ;;  %v394_v0 = vlaneseq  ;;  %v977_v1 = vmov 0   ;;  %vm410_vm0 = vcmask 130048   ;;  %v384_v5 = vld [vmem:[%s1163_s2] sm:$0xff]  ;;  %s978_s20 = smov 1   ;;  %vm979_vm4 = vmmov 1  }
  0x2a   : > { %971 = vsyncadd (%p1178_p7), [#allocation3], 4294967168  ;;  %934 = vset.pattern.permute.xlu0 %v977_v1  ;;  %935 = vset.pattern.permute.xlu1 %v977_v1  ;;  %v386_v9 = vld [vmem:[%s1164_s3] sm:$0xff]  ;;  %v385_v16 = vld [vmem:[%s1163_s2 + $0x8] sm:$0xff]  ;;  %v980_v17 = vmov 0.0|0.0   ;;  %vm981_vm8 = vmmov 0  }
  0x2b   : > { %s1184_s14 = smov (!%p371_p9, %s1045_s14), 1  ;;  %v395_v2 = vshrl.u32 %v394_v0, 7  ;;  %866 = vmatprep.mubr.msk.f32.mxu0 %vm410_vm0, %v384_v5  ;;  %896 = vmatprep.subr.bf16.mxu1 %v980_v17  ;;  %v982_v18 = vmov 0.0   ;;  %v389_v24 = vld [vmem:[%s1166_s5] sm:$0xff]  ;;  %v387_v25 = vld [vmem:[%s1164_s3 + $0x8] sm:$0xff]  ;;  %s983_s16 = smov 2  }
  0x2c   : > { %s836_s29 = sshll.u32 %s1184_s14, 3  ;;  %s377_s12 = scalar_lea.vmem %s1162_s1, %s1184_s14  ;;  %873 = vmatprep.mubr.msk.f32.mxu1 %vm981_vm8, %v982_v18  ;;  %v578_v26 = vld [vmem:[%s1168_s7] sm:$0xff] }
  0x2d   : > { %s374_s17 = scalar_lea.vmem %s1161_s0, %s836_s29  ;;  %v382_v4 = vld [vmem:[%s377_s12] sm:$0x1]  ;;  %v396_v6 = vsub.s32 0, %v395_v2  ;;  %s381_s23 = scalar_lea.vmem %s1171_s10, %s836_s29 }
  0x2e   : > { %v383_v3 = vld [vmem:[%s374_s17] sm:$0xff]  ;;  %vm390_vm1 = vcmp.ge.s32.totalorder %v382_v4, 1  ;;  %vm581_vm2 = vcmp.ge.s32.totalorder %v382_v4, 2 }
  0x2f   : > { %391 = vrot.lane.b32.xlu0 %v383_v3, %s978_s20  ;;  %v393_v7 = vsel %vm390_vm1, 1, %v977_v1  ;;  %v584_v8 = vsel %vm581_vm2, 1, %v977_v1  ;;  %v580_v27 = vld [vmem:[%s1170_s9] sm:$0xff] }
  0x30   : > { %v588_v10 = vrot.slane %v584_v8, %v396_v6  ;;  %v397_v12 = vrot.slane %v393_v7, %v396_v6  ;;  %v388_v30 = vld [vmem:[#allocation2] sm:$0xff] }
  0x31   : > { %v577_v42 = vld [vmem:[%s1167_s6] sm:$0xff] }
  0x32   : > { %vm589_vm3 = vcmp.eq.s32.totalorder %v588_v10, 1  ;;  %vm398_vm6 = vcmp.eq.s32.totalorder %v397_v12, 1  ;;  %v579_v50 = vld [vmem:[%s1169_s8] sm:$0xff] }
  0x33   : > { %402 = vperm.xlu0 %934, %v386_v9   ;;  %vm1106_vm5 = vmpackc.low %vm979_vm4, %vm589_vm3 }
  0x34   : > { %vm1110_vm7 = vmpackc.low %vm979_vm4, %vm398_vm6 }
  0xa1   : > { %v392_v13 = vpop.permute.xlu0 %391 }
  0xa2   : > { %v890_v15 = vpack.c.bf16 %v383_v3, %v392_v13 }
  0xa4   : > { %892 = vmatprep.subr.msk.bf16.mxu0 %vm1110_vm7, %v890_v15 }
  0xa5   : > { %895 = vmatpush3.bf16.msk.msra.mxu0 %vm1110_vm7, %v890_v15 }
  0xa6   : > { %900 = vmatprep.subr.bf16.mxu0 %v980_v17 }
  0xa8   : > { %867 = vmatmul.mubr.msk.f32.vlgmr.msra.gmra.mrb[0].mxu0 %vm410_vm0, %v385_v16 }
  0xa9   : > { %880 = vmatprep.mubr.msk.f32.mxu0 %vm981_vm8, %v982_v18 }
  0xb2   : > { %v403_v19 = vpop.permute.xlu0 %402 }
 0x17b   : > { %v868_v20 = vpop.f32.mrb[0].mxu0 }
 0x17c   : > { %v483_v21 = vpop.f32.mrb[1].mxu0 }
 0x17d   : > { %v484_v22 = vadd.f32 %v483_v21, %v403_v19 }
 0x17f   : > { %v492_v23 = vmax.f32 %v484_v22, 0.0 }
 0x181   : > { %493 = vrot.lane.b32.xlu1 %v492_v23, %s978_s20 }
 0x185   : > { %498 = vperm.xlu1 %935, %v389_v24  }
 0x189   : > { %407 = vperm.xlu1 %935, %v387_v25  }
 0x18d   : > { %593 = vperm.xlu1 %935, %v578_v26  }
 0x191   : > { %675 = vperm.xlu1 %935, %v580_v27  }
 0x1f3   : > { %v494_v28 = vpop.permute.xlu1 %493 }
 0x1f4   : > { %v897_v29 = vpack.c.bf16 %v492_v23, %v494_v28 }
 0x1f6   : > { %899 = vmatpush3.bf16.msk.msra.mxu1 %vm1110_vm7, %v897_v29 }
 0x1f7   : > { %904 = vmatprep.subr.bf16.mxu1 %v980_v17 }
 0x1f9   : > { %874 = vmatmul.mubr.msk.f32.vlgmr.msra.gmra.mrb[0].mxu1 %vm410_vm0, %v388_v30 }
 0x1fa   : > { %887 = vmatprep.mubr.msk.f32.mxu1 %vm981_vm8, %v982_v18 }
 0x204   : > { %v499_v31 = vpop.permute.xlu1 %498 }
 0x208   : > { %v408_v32 = vpop.permute.xlu1 %407 }
 0x209   : > { %v489_v36 = vadd.f32 %v868_v20, %v408_v32 }
 0x20c   : > { %v594_v43 = vpop.permute.xlu1 %593 }
 0x210   : > { %v676_v51 = vpop.permute.xlu1 %675 }
 0x2cc   : > { %v570_v33 = vpop.f32.mrb[0].mxu1 }
 0x2cd   : > { %v571_v34 = vadd.f32 %v570_v33, %v499_v31  ;;  %v875_v35 = vpop.f32.mrb[1].mxu1 }
 0x2cf   : > { %v574_v37 = vmax.f32 %v571_v34, 0.0 }
 0x2d1   : > { %v575_v38 = vadd.f32 %v574_v37, %v489_v36 }
 0x2d3   : > { %v576_v39 = vmax.f32 %v575_v38, 0.0 }
 0x2d5   : > { %582 = vrot.lane.b32.xlu0 %v576_v39, %s983_s16 }
 0x347   : > { %v583_v40 = vpop.permute.xlu0 %582 }
 0x348   : > { %v901_v41 = vpack.c.bf16 %v576_v39, %v583_v40 }
 0x34a   : > { %903 = vmatpush3.bf16.msk.msra.mxu0 %vm1106_vm5, %v901_v41 }
 0x34d   : > { %881 = vmatmul.mubr.msk.f32.vlgmr.msra.gmra.mrb[2].mxu0 %vm410_vm0, %v577_v42 }
 0x420   : > { %v665_v44 = vpop.f32.mrb[2].mxu0 }
 0x421   : > { %v666_v45 = vadd.f32 %v665_v44, %v594_v43  ;;  %v882_v46 = vpop.f32.mrb[3].mxu0 }
 0x423   : > { %v669_v47 = vmax.f32 %v666_v45, 0.0 }
 0x425   : > { %670 = vrot.lane.b32.xlu0 %v669_v47, %s983_s16 }
 0x497   : > { %v671_v48 = vpop.permute.xlu0 %670 }
 0x498   : > { %v905_v49 = vpack.c.bf16 %v669_v47, %v671_v48 }
 0x49a   : > { %907 = vmatpush3.bf16.msk.msra.mxu1 %vm1106_vm5, %v905_v49 }
 0x49d   : > { %888 = vmatmul.mubr.msk.f32.vlgmr.msra.gmra.mrb[2].mxu1 %vm410_vm0, %v579_v50 }
 0x570   : > { %v747_v52 = vpop.f32.mrb[2].mxu1 }
 0x571   : > { %v748_v53 = vadd.f32 %v747_v52, %v676_v51  ;;  %v889_v54 = vpop.f32.mrb[3].mxu1 }
 0x573   : > { %v751_v55 = vmax.f32 %v748_v53, 0.0 }
 0x575   : > { %v752_v56 = vadd.f32 %v751_v55, %v576_v39 }
 0x577   : > { %v753_v57 = vmax.f32 %v752_v56, 0.0 }
 0x579   : > { %754 = vst [vmem:[%s381_s23] sm:$0xff] %v753_v57 }
 0x57a PF: > { %s21_s13 = sadd.s32 1, %s974_s13  }
 0x57b   : > { %p18_p2 = scmp.ge.s32.totalorder %s21_s13, 4  }
 0x57d   :  { %20 = sbr.rel (!%p18_p2) target bundleno = 1 (0x1), region = 98 }
 0x584   :  { %774 = vsyncpa [#allocation3], 1 }
 0x585   :  { %776 = vsyncpa [#allocation3 + $0x1], 1 }

</bundles_post_ra>
